<compile_context>
chip_gen: v6e
topology: v6e:2x2x1
jax: 0.10.0
libtpu: 0.0.40
codegen_flags: <defaults>
</compile_context>

<pallas_src>
import jax
import jax.numpy as jnp
from jax import lax
from jax.experimental import pallas as pl
from jax.experimental.pallas import tpu as pltpu

# Deterministic LIF parameters (no learnable weights in this module).
TAU_M = 2.0
U_THRESHOLD = 1.0
U_REST = 0.0

_LANE = 128
_SUBLANE = 8
_TM_TARGET = 512   # sublanes per feature tile -> 256 KiB contiguous rows per step
_TT_TARGET = 16    # time steps per chunk (amortizes ~0.35us per-grid-step overhead)


def _temporal_lif_kernel(x_ref, o_ref, h_ref):
    """One grid step == one (feature-slice, time-chunk) tile.

    x_ref : (Tt, TM, 128) VMEM input tile (membrane input current).
    o_ref : (Tt, TM, 128) VMEM output tile (spikes, possibly narrow dtype).
    h_ref : (TM, 128) f32 persistent membrane-potential scratch carried across the
            sequential time-chunk grid axis.
    """
    tc = pl.program_id(1)  # time-chunk index (sequential / "arbitrary" axis)

    # Temporal container starts every forward pass from a freshly-reset module:
    # re-initialize the membrane state at the first time chunk of each feature slice.
    @pl.when(tc == 0)
    def _():
        h_ref[...] = jnp.full_like(h_ref, U_REST)

    decay = jnp.float32(1.0 - 1.0 / TAU_M)
    scale = jnp.float32(1.0 / TAU_M)
    tt_steps = x_ref.shape[0]  # static Tt

    def step(tt, carry):
        x = x_ref[tt].astype(jnp.float32)   # (TM, 128) dense tile
        h = h_ref[...]
        # Leaky integrate (U_REST == 0 folded into the decay form).
        u = h * decay + x * scale
        # Spike (Heaviside) + hard reset via select.
        spike = u >= U_THRESHOLD
        o_ref[tt] = spike.astype(o_ref.dtype)
        h_ref[...] = jnp.where(spike, jnp.float32(U_REST), u)
        return carry

    lax.fori_loop(0, tt_steps, step, 0, unroll=True)


def temporal_lif_forward(x, out_dtype=None):
    """x: [T, B, ...] float32 -> spikes y: [T, B, ...] in `out_dtype`.

    out_dtype defaults to x.dtype (matches the PyTorch module's float spikes).
    Passing jnp.int8 / jnp.bfloat16 is lossless (spikes are exactly {0,1}) and cuts
    the HBM write traffic 4x / 2x for this memory-bound kernel.
    """
    if out_dtype is None:
        out_dtype = x.dtype
    out_dtype = jnp.dtype(out_dtype)

    orig_shape = x.shape
    T = int(orig_shape[0])
    F = 1
    for d in orig_shape[1:]:
        F *= int(d)

    # Flatten features; pad the lane tail only when strictly needed (F % 128 != 0),
    # so aligned shapes avoid two extra full-array HBM passes in the wrapper.
    x2 = x.reshape(T, F)
    F_pad = pl.cdiv(F, _LANE) * _LANE
    if F_pad != F:
        x2 = jnp.pad(x2, ((0, 0), (0, F_pad - F)))
    M = F_pad // _LANE
    x3 = x2.reshape(T, M, _LANE)

    # Tile selection: grow TM first (DMA burst length), then Tt; cdiv grids handle
    # ragged extents with a masked partial last block instead of degenerate tiles.
    # TM is either the full M extent (always a legal block dim) or a large multiple
    # of 32 sublanes (legal packing for f32 / bf16 / int8 outputs).
    TM = M if M <= _TM_TARGET else _TM_TARGET
    Tt = T if T <= _TT_TARGET else _TT_TARGET
    grid = (pl.cdiv(M, TM), pl.cdiv(T, Tt))
    # TODO(synk): on v7x, prefer TM such that cdiv(M, TM) is even (>=4) for 2-TC
    # load balance; on single-TC v5e/v6e the largest TM wins, which is what we pick.

    # VMEM budget: 2x double-buffered input + 2x double-buffered output + h scratch.
    in_bytes = Tt * TM * _LANE * x.dtype.itemsize
    out_bytes = Tt * TM * _LANE * out_dtype.itemsize
    vmem_needed = 2 * in_bytes + 2 * out_bytes + TM * _LANE * 4
    vmem_limit = int(min(max(vmem_needed * 3 // 2, 8 * 1024 * 1024),
                         48 * 1024 * 1024))

    y3 = pl.pallas_call(
        _temporal_lif_kernel,
        out_shape=jax.ShapeDtypeStruct((T, M, _LANE), out_dtype),
        grid_spec=pltpu.PrefetchScalarGridSpec(
            num_scalar_prefetch=0,
            grid=grid,
            in_specs=[pl.BlockSpec((Tt, TM, _LANE), lambda m, tc: (tc, m, 0))],
            out_specs=pl.BlockSpec((Tt, TM, _LANE), lambda m, tc: (tc, m, 0)),
            scratch_shapes=[pltpu.VMEM((TM, _LANE), jnp.float32)],
        ),
        compiler_params=pltpu.CompilerParams(
            # Feature slices are independent (parallel, sharded across TCs on v7x);
            # the time-chunk axis carries the recurrent state -> sequential.
            dimension_semantics=("parallel", "arbitrary"),
            vmem_limit_bytes=vmem_limit,
        ),
    )(x3)

    if F_pad != F:
        y2 = y3.reshape(T, F_pad)[:, :F]
    else:
        y2 = y3.reshape(T, F_pad)
    return y2.reshape(orig_shape)


def _reference(x):
    """Pure-JAX reference of Temporal(LIF) for correctness checking."""
    def step(h, xt):
        u = h + (1.0 / TAU_M) * (-(h - U_REST) + xt)
        o = (u >= U_THRESHOLD).astype(x.dtype)
        h_new = u * (1.0 - o) + U_REST * o
        return h_new, o

    h0 = jnp.full(x.shape[1:], U_REST, dtype=x.dtype)
    _, y = jax.lax.scan(step, h0, x)
    return y


if __name__ == "__main__":
    # Aligned small shape [T, B, C, H, W]: F = 2*4*16*32 = 4096 -> M = 32 (no padding).
    T, B, C, H, W = 8, 2, 4, 16, 32
    key = jax.random.PRNGKey(0)
    x = jax.random.normal(key, (T, B, C, H, W), dtype=jnp.float32)

    y = jax.block_until_ready(temporal_lif_forward(x))
    y_ref = _reference(x)
    assert y.shape == x.shape and y.dtype == x.dtype
    assert jnp.allclose(y, y_ref, atol=1e-5), "f32 output mismatch vs reference"

    # Narrow spike dtype (perf option): values are exactly {0,1}, 4x less HBM write.
    y_i8 = jax.block_until_ready(temporal_lif_forward(x, out_dtype=jnp.int8))
    assert jnp.array_equal(y_i8.astype(jnp.float32), y_ref), "int8 output mismatch"

    # Ragged shape: exercises the lane-tail padding and the cdiv partial time chunk.
    xr = jax.random.normal(jax.random.PRNGKey(1), (20, 2, 3, 9, 11), dtype=jnp.float32)
    yr = jax.block_until_ready(temporal_lif_forward(xr))
    assert jnp.allclose(yr, _reference(xr), atol=1e-5), "ragged-shape mismatch"

    print("KERNEL_OK")
</pallas_src>

<mosaic_0001>
module attributes {stable_mosaic.version = 11 : i64} {
  func.func @_temporal_lif_kernel(%arg0: i32, %arg1: i32, %arg2: memref<8x32x128xf32, #tpu.memory_space<vmem>>, %arg3: memref<8x32x128xf32, #tpu.memory_space<vmem>>, %arg4: memref<32x128xf32, #tpu.memory_space<vmem>>) attributes {dimension_semantics = [#tpu.dimension_semantics<parallel>, #tpu.dimension_semantics<arbitrary>], iteration_bounds = array<i64: 1, 1>, scalar_prefetch = 0 : i64, scratch_operands = 1 : i64, tpu.core_type = #tpu.core_type<tc>, window_params = [{transform_indices = @transform_0, window_bounds = array<i64: 8, 32, 128>}, {transform_indices = @transform_1, window_bounds = array<i64: 8, 32, 128>}]} {
    %c0_i32 = arith.constant 0 : i32
    %0 = arith.cmpi eq, %arg1, %c0_i32 : i32
    %1 = arith.extui %0 : i1 to i32
    %c0_i32_0 = arith.constant 0 : i32
    %2 = arith.cmpi ne, %1, %c0_i32_0 : i32
    scf.if %2 {
      %cst_82 = arith.constant 0.000000e+00 : f32
      %163 = vector.broadcast %cst_82 : f32 to vector<32x128xf32>
      %c0_83 = arith.constant 0 : index
      %c0_84 = arith.constant 0 : index
      %164 = vector.load %arg4[%c0_83, %c0_84] : memref<32x128xf32, #tpu.memory_space<vmem>>, vector<32x128xf32>
      tpu.vector_store %arg4[%c0_83, %c0_84], %163 {strides = array<i32>} : memref<32x128xf32, #tpu.memory_space<vmem>>, vector<32x128xf32>,
    } else {
    }
    %cst = arith.constant 5.000000e-01 : f32
    %cst_1 = arith.constant 5.000000e-01 : f32
    %c0_i32_2 = arith.constant 0 : i32
    %3 = arith.index_cast %c0_i32_2 : i32 to index
    %c0 = arith.constant 0 : index
    %c0_3 = arith.constant 0 : index
    %4 = vector.load %arg2[%3, %c0, %c0_3] : memref<8x32x128xf32, #tpu.memory_space<vmem>>, vector<1x32x128xf32>
    %5 = vector.shape_cast %4 : vector<1x32x128xf32> to vector<32x128xf32>
    %c0_4 = arith.constant 0 : index
    %c0_5 = arith.constant 0 : index
    %6 = vector.load %arg4[%c0_4, %c0_5] : memref<32x128xf32, #tpu.memory_space<vmem>>, vector<32x128xf32>
    %7 = vector.broadcast %cst : f32 to vector<32x128xf32>
    %8 = arith.mulf %6, %7 : vector<32x128xf32>
    %9 = vector.broadcast %cst_1 : f32 to vector<32x128xf32>
    %10 = arith.mulf %5, %9 : vector<32x128xf32>
    %11 = arith.addf %8, %10 : vector<32x128xf32>
    %cst_6 = arith.constant 1.000000e+00 : f32
    %12 = vector.broadcast %cst_6 : f32 to vector<32x128xf32>
    %13 = arith.cmpf oge, %11, %12 : vector<32x128xf32>
    %14 = arith.extui %13 : vector<32x128xi1> to vector<32x128xi32>
    %15 = arith.sitofp %14 : vector<32x128xi32> to vector<32x128xf32>
    %16 = arith.index_cast %c0_i32_2 : i32 to index
    %c0_7 = arith.constant 0 : index
    %c0_8 = arith.constant 0 : index
    %17 = vector.load %arg3[%16, %c0_7, %c0_8] : memref<8x32x128xf32, #tpu.memory_space<vmem>>, vector<1x32x128xf32>
    %18 = vector.shape_cast %17 : vector<1x32x128xf32> to vector<32x128xf32>
    %19 = vector.shape_cast %15 : vector<32x128xf32> to vector<1x32x128xf32>
    tpu.vector_store %arg3[%16, %c0_7, %c0_8], %19 {strides = array<i32>} : memref<8x32x128xf32, #tpu.memory_space<vmem>>, vector<1x32x128xf32>,
    %cst_9 = arith.constant 0.000000e+00 : f32
    %20 = vector.broadcast %cst_9 : f32 to vector<32x128xf32>
    %21 = arith.select %13, %20, %11 : vector<32x128xi1>, vector<32x128xf32>
    %c0_10 = arith.constant 0 : index
    %c0_11 = arith.constant 0 : index
    %22 = vector.load %arg4[%c0_10, %c0_11] : memref<32x128xf32, #tpu.memory_space<vmem>>, vector<32x128xf32>
    tpu.vector_store %arg4[%c0_10, %c0_11], %21 {strides = array<i32>} : memref<32x128xf32, #tpu.memory_space<vmem>>, vector<32x128xf32>,
    %c1_i32 = arith.constant 1 : i32
    %23 = arith.index_cast %c1_i32 : i32 to index
    %c0_12 = arith.constant 0 : index
    %c0_13 = arith.constant 0 : index
    %24 = vector.load %arg2[%23, %c0_12, %c0_13] : memref<8x32x128xf32, #tpu.memory_space<vmem>>, vector<1x32x128xf32>
    %25 = vector.shape_cast %24 : vector<1x32x128xf32> to vector<32x128xf32>
    %c0_14 = arith.constant 0 : index
    %c0_15 = arith.constant 0 : index
    %26 = vector.load %arg4[%c0_14, %c0_15] : memref<32x128xf32, #tpu.memory_space<vmem>>, vector<32x128xf32>
    %27 = vector.broadcast %cst : f32 to vector<32x128xf32>
    %28 = arith.mulf %26, %27 : vector<32x128xf32>
    %29 = vector.broadcast %cst_1 : f32 to vector<32x128xf32>
    %30 = arith.mulf %25, %29 : vector<32x128xf32>
    %31 = arith.addf %28, %30 : vector<32x128xf32>
    %cst_16 = arith.constant 1.000000e+00 : f32
    %32 = vector.broadcast %cst_16 : f32 to vector<32x128xf32>
    %33 = arith.cmpf oge, %31, %32 : vector<32x128xf32>
    %34 = arith.extui %33 : vector<32x128xi1> to vector<32x128xi32>
    %35 = arith.sitofp %34 : vector<32x128xi32> to vector<32x128xf32>
    %36 = arith.index_cast %c1_i32 : i32 to index
    %c0_17 = arith.constant 0 : index
    %c0_18 = arith.constant 0 : index
    %37 = vector.load %arg3[%36, %c0_17, %c0_18] : memref<8x32x128xf32, #tpu.memory_space<vmem>>, vector<1x32x128xf32>
    %38 = vector.shape_cast %37 : vector<1x32x128xf32> to vector<32x128xf32>
    %39 = vector.shape_cast %35 : vector<32x128xf32> to vector<1x32x128xf32>
    tpu.vector_store %arg3[%36, %c0_17, %c0_18], %39 {strides = array<i32>} : memref<8x32x128xf32, #tpu.memory_space<vmem>>, vector<1x32x128xf32>,
    %cst_19 = arith.constant 0.000000e+00 : f32
    %40 = vector.broadcast %cst_19 : f32 to vector<32x128xf32>
    %41 = arith.select %33, %40, %31 : vector<32x128xi1>, vector<32x128xf32>
    %c0_20 = arith.constant 0 : index
    %c0_21 = arith.constant 0 : index
    %42 = vector.load %arg4[%c0_20, %c0_21] : memref<32x128xf32, #tpu.memory_space<vmem>>, vector<32x128xf32>
    tpu.vector_store %arg4[%c0_20, %c0_21], %41 {strides = array<i32>} : memref<32x128xf32, #tpu.memory_space<vmem>>, vector<32x128xf32>,
    %c2_i32 = arith.constant 2 : i32
    %43 = arith.index_cast %c2_i32 : i32 to index
    %c0_22 = arith.constant 0 : index
    %c0_23 = arith.constant 0 : index
    %44 = vector.load %arg2[%43, %c0_22, %c0_23] : memref<8x32x128xf32, #tpu.memory_space<vmem>>, vector<1x32x128xf32>
    %45 = vector.shape_cast %44 : vector<1x32x128xf32> to vector<32x128xf32>
    %c0_24 = arith.constant 0 : index
    %c0_25 = arith.constant 0 : index
    %46 = vector.load %arg4[%c0_24, %c0_25] : memref<32x128xf32, #tpu.memory_space<vmem>>, vector<32x128xf32>
    %47 = vector.broadcast %cst : f32 to vector<32x128xf32>
    %48 = arith.mulf %46, %47 : vector<32x128xf32>
    %49 = vector.broadcast %cst_1 : f32 to vector<32x128xf32>
    %50 = arith.mulf %45, %49 : vector<32x128xf32>
    %51 = arith.addf %48, %50 : vector<32x128xf32>
    %cst_26 = arith.constant 1.000000e+00 : f32
    %52 = vector.broadcast %cst_26 : f32 to vector<32x128xf32>
    %53 = arith.cmpf oge, %51, %52 : vector<32x128xf32>
    %54 = arith.extui %53 : vector<32x128xi1> to vector<32x128xi32>
    %55 = arith.sitofp %54 : vector<32x128xi32> to vector<32x128xf32>
    %56 = arith.index_cast %c2_i32 : i32 to index
    %c0_27 = arith.constant 0 : index
    %c0_28 = arith.constant 0 : index
    %57 = vector.load %arg3[%56, %c0_27, %c0_28] : memref<8x32x128xf32, #tpu.memory_space<vmem>>, vector<1x32x128xf32>
    %58 = vector.shape_cast %57 : vector<1x32x128xf32> to vector<32x128xf32>
    %59 = vector.shape_cast %55 : vector<32x128xf32> to vector<1x32x128xf32>
    tpu.vector_store %arg3[%56, %c0_27, %c0_28], %59 {strides = array<i32>} : memref<8x32x128xf32, #tpu.memory_space<vmem>>, vector<1x32x128xf32>,
    %cst_29 = arith.constant 0.000000e+00 : f32
    %60 = vector.broadcast %cst_29 : f32 to vector<32x128xf32>
    %61 = arith.select %53, %60, %51 : vector<32x128xi1>, vector<32x128xf32>
    %c0_30 = arith.constant 0 : index
    %c0_31 = arith.constant 0 : index
    %62 = vector.load %arg4[%c0_30, %c0_31] : memref<32x128xf32, #tpu.memory_space<vmem>>, vector<32x128xf32>
    tpu.vector_store %arg4[%c0_30, %c0_31], %61 {strides = array<i32>} : memref<32x128xf32, #tpu.memory_space<vmem>>, vector<32x128xf32>,
    %c3_i32 = arith.constant 3 : i32
    %63 = arith.index_cast %c3_i32 : i32 to index
    %c0_32 = arith.constant 0 : index
    %c0_33 = arith.constant 0 : index
    %64 = vector.load %arg2[%63, %c0_32, %c0_33] : memref<8x32x128xf32, #tpu.memory_space<vmem>>, vector<1x32x128xf32>
    %65 = vector.shape_cast %64 : vector<1x32x128xf32> to vector<32x128xf32>
    %c0_34 = arith.constant 0 : index
    %c0_35 = arith.constant 0 : index
    %66 = vector.load %arg4[%c0_34, %c0_35] : memref<32x128xf32, #tpu.memory_space<vmem>>, vector<32x128xf32>
    %67 = vector.broadcast %cst : f32 to vector<32x128xf32>
    %68 = arith.mulf %66, %67 : vector<32x128xf32>
    %69 = vector.broadcast %cst_1 : f32 to vector<32x128xf32>
    %70 = arith.mulf %65, %69 : vector<32x128xf32>
    %71 = arith.addf %68, %70 : vector<32x128xf32>
    %cst_36 = arith.constant 1.000000e+00 : f32
    %72 = vector.broadcast %cst_36 : f32 to vector<32x128xf32>
    %73 = arith.cmpf oge, %71, %72 : vector<32x128xf32>
    %74 = arith.extui %73 : vector<32x128xi1> to vector<32x128xi32>
    %75 = arith.sitofp %74 : vector<32x128xi32> to vector<32x128xf32>
    %76 = arith.index_cast %c3_i32 : i32 to index
    %c0_37 = arith.constant 0 : index
    %c0_38 = arith.constant 0 : index
    %77 = vector.load %arg3[%76, %c0_37, %c0_38] : memref<8x32x128xf32, #tpu.memory_space<vmem>>, vector<1x32x128xf32>
    %78 = vector.shape_cast %77 : vector<1x32x128xf32> to vector<32x128xf32>
    %79 = vector.shape_cast %75 : vector<32x128xf32> to vector<1x32x128xf32>
    tpu.vector_store %arg3[%76, %c0_37, %c0_38], %79 {strides = array<i32>} : memref<8x32x128xf32, #tpu.memory_space<vmem>>, vector<1x32x128xf32>,
    %cst_39 = arith.constant 0.000000e+00 : f32
    %80 = vector.broadcast %cst_39 : f32 to vector<32x128xf32>
    %81 = arith.select %73, %80, %71 : vector<32x128xi1>, vector<32x128xf32>
    %c0_40 = arith.constant 0 : index
    %c0_41 = arith.constant 0 : index
    %82 = vector.load %arg4[%c0_40, %c0_41] : memref<32x128xf32, #tpu.memory_space<vmem>>, vector<32x128xf32>
    tpu.vector_store %arg4[%c0_40, %c0_41], %81 {strides = array<i32>} : memref<32x128xf32, #tpu.memory_space<vmem>>, vector<32x128xf32>,
    %c4_i32 = arith.constant 4 : i32
    %83 = arith.index_cast %c4_i32 : i32 to index
    %c0_42 = arith.constant 0 : index
    %c0_43 = arith.constant 0 : index
    %84 = vector.load %arg2[%83, %c0_42, %c0_43] : memref<8x32x128xf32, #tpu.memory_space<vmem>>, vector<1x32x128xf32>
    %85 = vector.shape_cast %84 : vector<1x32x128xf32> to vector<32x128xf32>
    %c0_44 = arith.constant 0 : index
    %c0_45 = arith.constant 0 : index
    %86 = vector.load %arg4[%c0_44, %c0_45] : memref<32x128xf32, #tpu.memory_space<vmem>>, vector<32x128xf32>
    %87 = vector.broadcast %cst : f32 to vector<32x128xf32>
    %88 = arith.mulf %86, %87 : vector<32x128xf32>
    %89 = vector.broadcast %cst_1 : f32 to vector<32x128xf32>
    %90 = arith.mulf %85, %89 : vector<32x128xf32>
    %91 = arith.addf %88, %90 : vector<32x128xf32>
    %cst_46 = arith.constant 1.000000e+00 : f32
    %92 = vector.broadcast %cst_46 : f32 to vector<32x128xf32>
    %93 = arith.cmpf oge, %91, %92 : vector<32x128xf32>
    %94 = arith.extui %93 : vector<32x128xi1> to vector<32x128xi32>
    %95 = arith.sitofp %94 : vector<32x128xi32> to vector<32x128xf32>
    %96 = arith.index_cast %c4_i32 : i32 to index
    %c0_47 = arith.constant 0 : index
    %c0_48 = arith.constant 0 : index
    %97 = vector.load %arg3[%96, %c0_47, %c0_48] : memref<8x32x128xf32, #tpu.memory_space<vmem>>, vector<1x32x128xf32>
    %98 = vector.shape_cast %97 : vector<1x32x128xf32> to vector<32x128xf32>
    %99 = vector.shape_cast %95 : vector<32x128xf32> to vector<1x32x128xf32>
    tpu.vector_store %arg3[%96, %c0_47, %c0_48], %99 {strides = array<i32>} : memref<8x32x128xf32, #tpu.memory_space<vmem>>, vector<1x32x128xf32>,
    %cst_49 = arith.constant 0.000000e+00 : f32
    %100 = vector.broadcast %cst_49 : f32 to vector<32x128xf32>
    %101 = arith.select %93, %100, %91 : vector<32x128xi1>, vector<32x128xf32>
    %c0_50 = arith.constant 0 : index
    %c0_51 = arith.constant 0 : index
    %102 = vector.load %arg4[%c0_50, %c0_51] : memref<32x128xf32, #tpu.memory_space<vmem>>, vector<32x128xf32>
    tpu.vector_store %arg4[%c0_50, %c0_51], %101 {strides = array<i32>} : memref<32x128xf32, #tpu.memory_space<vmem>>, vector<32x128xf32>,
    %c5_i32 = arith.constant 5 : i32
    %103 = arith.index_cast %c5_i32 : i32 to index
    %c0_52 = arith.constant 0 : index
    %c0_53 = arith.constant 0 : index
    %104 = vector.load %arg2[%103, %c0_52, %c0_53] : memref<8x32x128xf32, #tpu.memory_space<vmem>>, vector<1x32x128xf32>
    %105 = vector.shape_cast %104 : vector<1x32x128xf32> to vector<32x128xf32>
    %c0_54 = arith.constant 0 : index
    %c0_55 = arith.constant 0 : index
    %106 = vector.load %arg4[%c0_54, %c0_55] : memref<32x128xf32, #tpu.memory_space<vmem>>, vector<32x128xf32>
    %107 = vector.broadcast %cst : f32 to vector<32x128xf32>
    %108 = arith.mulf %106, %107 : vector<32x128xf32>
    %109 = vector.broadcast %cst_1 : f32 to vector<32x128xf32>
    %110 = arith.mulf %105, %109 : vector<32x128xf32>
    %111 = arith.addf %108, %110 : vector<32x128xf32>
    %cst_56 = arith.constant 1.000000e+00 : f32
    %112 = vector.broadcast %cst_56 : f32 to vector<32x128xf32>
    %113 = arith.cmpf oge, %111, %112 : vector<32x128xf32>
    %114 = arith.extui %113 : vector<32x128xi1> to vector<32x128xi32>
    %115 = arith.sitofp %114 : vector<32x128xi32> to vector<32x128xf32>
    %116 = arith.index_cast %c5_i32 : i32 to index
    %c0_57 = arith.constant 0 : index
    %c0_58 = arith.constant 0 : index
    %117 = vector.load %arg3[%116, %c0_57, %c0_58] : memref<8x32x128xf32, #tpu.memory_space<vmem>>, vector<1x32x128xf32>
    %118 = vector.shape_cast %117 : vector<1x32x128xf32> to vector<32x128xf32>
    %119 = vector.shape_cast %115 : vector<32x128xf32> to vector<1x32x128xf32>
    tpu.vector_store %arg3[%116, %c0_57, %c0_58], %119 {strides = array<i32>} : memref<8x32x128xf32, #tpu.memory_space<vmem>>, vector<1x32x128xf32>,
    %cst_59 = arith.constant 0.000000e+00 : f32
    %120 = vector.broadcast %cst_59 : f32 to vector<32x128xf32>
    %121 = arith.select %113, %120, %111 : vector<32x128xi1>, vector<32x128xf32>
    %c0_60 = arith.constant 0 : index
    %c0_61 = arith.constant 0 : index
    %122 = vector.load %arg4[%c0_60, %c0_61] : memref<32x128xf32, #tpu.memory_space<vmem>>, vector<32x128xf32>
    tpu.vector_store %arg4[%c0_60, %c0_61], %121 {strides = array<i32>} : memref<32x128xf32, #tpu.memory_space<vmem>>, vector<32x128xf32>,
    %c6_i32 = arith.constant 6 : i32
    %123 = arith.index_cast %c6_i32 : i32 to index
    %c0_62 = arith.constant 0 : index
    %c0_63 = arith.constant 0 : index
    %124 = vector.load %arg2[%123, %c0_62, %c0_63] : memref<8x32x128xf32, #tpu.memory_space<vmem>>, vector<1x32x128xf32>
    %125 = vector.shape_cast %124 : vector<1x32x128xf32> to vector<32x128xf32>
    %c0_64 = arith.constant 0 : index
    %c0_65 = arith.constant 0 : index
    %126 = vector.load %arg4[%c0_64, %c0_65] : memref<32x128xf32, #tpu.memory_space<vmem>>, vector<32x128xf32>
    %127 = vector.broadcast %cst : f32 to vector<32x128xf32>
    %128 = arith.mulf %126, %127 : vector<32x128xf32>
    %129 = vector.broadcast %cst_1 : f32 to vector<32x128xf32>
    %130 = arith.mulf %125, %129 : vector<32x128xf32>
    %131 = arith.addf %128, %130 : vector<32x128xf32>
    %cst_66 = arith.constant 1.000000e+00 : f32
    %132 = vector.broadcast %cst_66 : f32 to vector<32x128xf32>
    %133 = arith.cmpf oge, %131, %132 : vector<32x128xf32>
    %134 = arith.extui %133 : vector<32x128xi1> to vector<32x128xi32>
    %135 = arith.sitofp %134 : vector<32x128xi32> to vector<32x128xf32>
    %136 = arith.index_cast %c6_i32 : i32 to index
    %c0_67 = arith.constant 0 : index
    %c0_68 = arith.constant 0 : index
    %137 = vector.load %arg3[%136, %c0_67, %c0_68] : memref<8x32x128xf32, #tpu.memory_space<vmem>>, vector<1x32x128xf32>
    %138 = vector.shape_cast %137 : vector<1x32x128xf32> to vector<32x128xf32>
    %139 = vector.shape_cast %135 : vector<32x128xf32> to vector<1x32x128xf32>
    tpu.vector_store %arg3[%136, %c0_67, %c0_68], %139 {strides = array<i32>} : memref<8x32x128xf32, #tpu.memory_space<vmem>>, vector<1x32x128xf32>,
    %cst_69 = arith.constant 0.000000e+00 : f32
    %140 = vector.broadcast %cst_69 : f32 to vector<32x128xf32>
    %141 = arith.select %133, %140, %131 : vector<32x128xi1>, vector<32x128xf32>
    %c0_70 = arith.constant 0 : index
    %c0_71 = arith.constant 0 : index
    %142 = vector.load %arg4[%c0_70, %c0_71] : memref<32x128xf32, #tpu.memory_space<vmem>>, vector<32x128xf32>
    tpu.vector_store %arg4[%c0_70, %c0_71], %141 {strides = array<i32>} : memref<32x128xf32, #tpu.memory_space<vmem>>, vector<32x128xf32>,
    %c7_i32 = arith.constant 7 : i32
    %143 = arith.index_cast %c7_i32 : i32 to index
    %c0_72 = arith.constant 0 : index
    %c0_73 = arith.constant 0 : index
    %144 = vector.load %arg2[%143, %c0_72, %c0_73] : memref<8x32x128xf32, #tpu.memory_space<vmem>>, vector<1x32x128xf32>
    %145 = vector.shape_cast %144 : vector<1x32x128xf32> to vector<32x128xf32>
    %c0_74 = arith.constant 0 : index
    %c0_75 = arith.constant 0 : index
    %146 = vector.load %arg4[%c0_74, %c0_75] : memref<32x128xf32, #tpu.memory_space<vmem>>, vector<32x128xf32>
    %147 = vector.broadcast %cst : f32 to vector<32x128xf32>
    %148 = arith.mulf %146, %147 : vector<32x128xf32>
    %149 = vector.broadcast %cst_1 : f32 to vector<32x128xf32>
    %150 = arith.mulf %145, %149 : vector<32x128xf32>
    %151 = arith.addf %148, %150 : vector<32x128xf32>
    %cst_76 = arith.constant 1.000000e+00 : f32
    %152 = vector.broadcast %cst_76 : f32 to vector<32x128xf32>
    %153 = arith.cmpf oge, %151, %152 : vector<32x128xf32>
    %154 = arith.extui %153 : vector<32x128xi1> to vector<32x128xi32>
    %155 = arith.sitofp %154 : vector<32x128xi32> to vector<32x128xf32>
    %156 = arith.index_cast %c7_i32 : i32 to index
    %c0_77 = arith.constant 0 : index
    %c0_78 = arith.constant 0 : index
    %157 = vector.load %arg3[%156, %c0_77, %c0_78] : memref<8x32x128xf32, #tpu.memory_space<vmem>>, vector<1x32x128xf32>
    %158 = vector.shape_cast %157 : vector<1x32x128xf32> to vector<32x128xf32>
    %159 = vector.shape_cast %155 : vector<32x128xf32> to vector<1x32x128xf32>
    tpu.vector_store %arg3[%156, %c0_77, %c0_78], %159 {strides = array<i32>} : memref<8x32x128xf32, #tpu.memory_space<vmem>>, vector<1x32x128xf32>,
    %cst_79 = arith.constant 0.000000e+00 : f32
    %160 = vector.broadcast %cst_79 : f32 to vector<32x128xf32>
    %161 = arith.select %153, %160, %151 : vector<32x128xi1>, vector<32x128xf32>
    %c0_80 = arith.constant 0 : index
    %c0_81 = arith.constant 0 : index
    %162 = vector.load %arg4[%c0_80, %c0_81] : memref<32x128xf32, #tpu.memory_space<vmem>>, vector<32x128xf32>
    tpu.vector_store %arg4[%c0_80, %c0_81], %161 {strides = array<i32>} : memref<32x128xf32, #tpu.memory_space<vmem>>, vector<32x128xf32>,
    %c8_i32 = arith.constant 8 : i32
    return
  }
  func.func @transform_0(%arg0: i32, %arg1: i32) -> (i32, i32, i32) {
    %c0_i32 = arith.constant 0 : i32
    %c0_i32_0 = arith.constant 0 : i32
    return %arg1, %arg0, %c0_i32 : i32, i32, i32
  }
  func.func @transform_1(%arg0: i32, %arg1: i32) -> (i32, i32, i32) {
    %c0_i32 = arith.constant 0 : i32
    %c0_i32_0 = arith.constant 0 : i32
    return %arg1, %arg0, %c0_i32 : i32, i32, i32
  }
}

</mosaic_0001>

<bundles_post_ra>
// kernel: tpu_custom_call.1
= control target key start
LH: loop header
LB: loop body
LE: loop exit
PB: predicated region body
PF: predicated region fallthrough
CT: control target
= control target key end

     0   :  { %6 = vsyncpa [#allocation4], 0  ;;  %s554_s0 = inlined_call_operand.hbm [shape: f32[8,32,128], index: 0, kind: input, shape index: {}]   ;;  %s555_s1 = inlined_call_operand.hbm [shape: f32[8,32,128], index: 1, kind: output, shape index: {}]  }
   0x1   :  { %7 = vsyncpa [#allocation5], 0  ;;  %s495_s6 = smov [#allocation3]  }
   0x2   :  { %s13_s7 = sshll.u32 %s495_s6, 4  ;;  %s14_s7 = int_to_ptr.vmem [resolvable:$true] %s13_s7 }
   0x3   :  { %s459_s8 = scalar_lea.vmem %s14_s7, 4096  ;;  %p464_p1 = scmp.lt.s32.totalorder %s14_s7, %s14_s7 }
   0x4   :  { %p460_p0 = scmp.ne.s32.totalorder %s14_s7, %s459_s8  ;;  %p465_p2 = scmp.lt.s32.totalorder %s459_s8, %s459_s8 }
   0x6   :  { %p466_p3 = por %p465_p2, %p464_p1 }
   0x8   :  { %p467_p4 = pnand %p466_p3, %p460_p0 }
   0xa   :  { %470 = shalt.err (!%p467_p4)
}
   0xb   :  { %s496_s9 = smov 128   ;;  %s497_s10 = smov 8  }
   0xc   :  { %19 = dma.hbm_to_vmem [thread:$0]  %s554_s0, 4096, %s14_s7, [#allocation4], %s496_s9, %s496_s9, %s497_s10  }
   0xd   :  { %491 = dma.done.wait [#allocation4], 4096  }
   0xe   :  { %492 = vsyncadd [#allocation4], 4294963200  ;;  %v31_v0 = vld [vmem:[#allocation3] sm:$0xff]  ;;  %v32_v1 = vld [vmem:[#allocation3 + $0x8] sm:$0xff]  ;;  %v498_v15 = vmov 0.0   ;;  %s499_s0 = smov [#allocation6]  }
   0xf   :  { %v33_v2 = vld [vmem:[#allocation3 + $0x10] sm:$0xff]  ;;  %v43_v3 = vmul.f32 0.5, %v31_v0  ;;  %v44_v4 = vmul.f32 0.5, %v32_v1  ;;  %v34_v6 = vld [vmem:[#allocation3 + $0x18] sm:$0xff]  ;;  %v76_v7 = vld [vmem:[#allocation3 + $0x20] sm:$0xff]  ;;  %s402_s13 = sshll.u32 %s499_s0, 4  ;;  %s403_s13 = int_to_ptr.vmem [resolvable:$true] %s402_s13 }
  0x10   :  { %v45_v5 = vmul.f32 0.5, %v33_v2  ;;  %v77_v8 = vld [vmem:[#allocation3 + $0x28] sm:$0xff]  ;;  %v46_v9 = vmul.f32 0.5, %v34_v6  ;;  %v88_v10 = vmul.f32 0.5, %v76_v7  ;;  %v78_v12 = vld [vmem:[#allocation3 + $0x30] sm:$0xff]  ;;  %v79_v14 = vld [vmem:[#allocation3 + $0x38] sm:$0xff]  ;;  %p476_p6 = scmp.lt.s32.totalorder %s403_s13, %s403_s13 }
  0x11   :  { %v89_v11 = vmul.f32 0.5, %v77_v8  ;;  %vm51_vm0 = vcmp.ge.f32.partialorder %v43_v3, 1.0  ;;  %vm52_vm1 = vcmp.ge.f32.partialorder %v44_v4, 1.0  ;;  %v90_v13 = vmul.f32 0.5, %v78_v12  ;;  %v122_v24 = vld [vmem:[#allocation3 + $0x40] sm:$0xff]  ;;  %v123_v27 = vld [vmem:[#allocation3 + $0x48] sm:$0xff] }
  0x12   :  { %vm53_vm2 = vcmp.ge.f32.partialorder %v45_v5, 1.0  ;;  %v414_v16 = vsel %vm51_vm0, 1.0, %v498_v15  ;;  %v67_v17 = vsel %vm51_vm0, 0.0, %v43_v3  ;;  %v415_v18 = vsel %vm52_vm1, 1.0, %v498_v15  ;;  %v124_v28 = vld [vmem:[#allocation3 + $0x50] sm:$0xff]  ;;  %v125_v38 = vld [vmem:[#allocation3 + $0x58] sm:$0xff] }
  0x13   :  { %v68_v19 = vsel %vm52_vm1, 0.0, %v44_v4  ;;  %63 = vst [vmem:[#allocation6] sm:$0xff] %v414_v16  ;;  %v84_v20 = vmul.f32 0.5, %v67_v17  ;;  %64 = vst [vmem:[#allocation6 + $0x8] sm:$0xff] %v415_v18  ;;  %v416_v22 = vsel %vm53_vm2, 1.0, %v498_v15  ;;  %v69_v23 = vsel %vm53_vm2, 0.0, %v45_v5 }
  0x14   :  { %v85_v21 = vmul.f32 0.5, %v68_v19  ;;  %65 = vst [vmem:[#allocation6 + $0x10] sm:$0xff] %v416_v22  ;;  %v86_v25 = vmul.f32 0.5, %v69_v23  ;;  %vm54_vm3 = vcmp.ge.f32.partialorder %v46_v9, 1.0  ;;  %v91_v26 = vmul.f32 0.5, %v79_v14  ;;  %v168_v39 = vld [vmem:[#allocation3 + $0x60] sm:$0xff] }
  0x15   :  { %v417_v29 = vsel %vm54_vm3, 1.0, %v498_v15  ;;  %v70_v30 = vsel %vm54_vm3, 0.0, %v46_v9  ;;  %v92_v31 = vadd.f32 %v88_v10, %v84_v20  ;;  %v134_v35 = vmul.f32 0.5, %v122_v24  ;;  %v169_v47 = vld [vmem:[#allocation3 + $0x68] sm:$0xff]  ;;  %v170_v48 = vld [vmem:[#allocation3 + $0x70] sm:$0xff]  ;;  %v171_v62 = vld [vmem:[#allocation3 + $0x78] sm:$0xff] }
  0x16   :  { %v93_v32 = vadd.f32 %v89_v11, %v85_v21  ;;  %66 = vst [vmem:[#allocation6 + $0x18] sm:$0xff] %v417_v29  ;;  %v87_v33 = vmul.f32 0.5, %v70_v30  ;;  %v94_v34 = vadd.f32 %v90_v13, %v86_v25  ;;  %v135_v36 = vmul.f32 0.5, %v123_v27  ;;  %v214_v63 = vld [vmem:[#allocation3 + $0x80] sm:$0xff]  ;;  %v215_v7 = vld [vmem:[#allocation3 + $0x88] sm:$0xff]  ;;  %v216_v8 = vld [vmem:[#allocation3 + $0x90] sm:$0xff] }
  0x17   :  { %vm96_vm4 = vcmp.ge.f32.partialorder %v92_v31, 1.0  ;;  %v136_v37 = vmul.f32 0.5, %v124_v28  ;;  %v137_v51 = vmul.f32 0.5, %v125_v38  ;;  %v180_v52 = vmul.f32 0.5, %v168_v39  ;;  %v217_v23 = vld [vmem:[#allocation3 + $0x98] sm:$0xff]  ;;  %v260_v24 = vld [vmem:[#allocation3 + $0xa0] sm:$0xff] }
  0x18   :  { %vm97_vm5 = vcmp.ge.f32.partialorder %v93_v32, 1.0  ;;  %v418_v40 = vsel %vm96_vm4, 1.0, %v498_v15  ;;  %v113_v41 = vsel %vm96_vm4, 0.0, %v92_v31  ;;  %vm98_vm6 = vcmp.ge.f32.partialorder %v94_v34, 1.0  ;;  %s471_s14 = scalar_lea.vmem %s403_s13, 4096 }
  0x19   :  { %v419_v42 = vsel %vm97_vm5, 1.0, %v498_v15  ;;  %v114_v43 = vsel %vm97_vm5, 0.0, %v93_v32  ;;  %109 = vst [vmem:[#allocation6 + $0x20] sm:$0xff] %v418_v40  ;;  %v130_v44 = vmul.f32 0.5, %v113_v41  ;;  %v95_v46 = vadd.f32 %v91_v26, %v87_v33  ;;  %v261_v32 = vld [vmem:[#allocation3 + $0xa8] sm:$0xff]  ;;  %v262_v33 = vld [vmem:[#allocation3 + $0xb0] sm:$0xff]  ;;  %p472_p5 = scmp.ne.s32.totalorder %s403_s13, %s471_s14  ;;  %p477_p7 = scmp.lt.s32.totalorder %s471_s14, %s471_s14 }
  0x1a   :  { %110 = vst [vmem:[#allocation6 + $0x28] sm:$0xff] %v419_v42  ;;  %v131_v45 = vmul.f32 0.5, %v114_v43  ;;  %v420_v49 = vsel %vm98_vm6, 1.0, %v498_v15  ;;  %v115_v50 = vsel %vm98_vm6, 0.0, %v94_v34  ;;  %v181_v58 = vmul.f32 0.5, %v169_v47  ;;  %v263_v47 = vld [vmem:[#allocation3 + $0xb8] sm:$0xff] }
  0x1b   :  { %111 = vst [vmem:[#allocation6 + $0x30] sm:$0xff] %v420_v49  ;;  %v132_v53 = vmul.f32 0.5, %v115_v50  ;;  %vm99_vm7 = vcmp.ge.f32.partialorder %v95_v46, 1.0  ;;  %v138_v54 = vadd.f32 %v134_v35, %v130_v44  ;;  %v182_v59 = vmul.f32 0.5, %v170_v48  ;;  %v306_v48 = vld [vmem:[#allocation3 + $0xc0] sm:$0xff]  ;;  %p478_p8 = por %p477_p7, %p476_p6 }
  0x1c   :  { %v139_v55 = vadd.f32 %v135_v36, %v131_v45  ;;  %v421_v56 = vsel %vm99_vm7, 1.0, %v498_v15  ;;  %v116_v57 = vsel %vm99_vm7, 0.0, %v95_v46  ;;  %v183_v11 = vmul.f32 0.5, %v171_v62 }
  0x1d   :  { %112 = vst [vmem:[#allocation6 + $0x38] sm:$0xff] %v421_v56  ;;  %v133_v60 = vmul.f32 0.5, %v116_v57  ;;  %vm142_vm8 = vcmp.ge.f32.partialorder %v138_v54, 1.0  ;;  %v140_v61 = vadd.f32 %v136_v37, %v132_v53  ;;  %v226_v12 = vmul.f32 0.5, %v214_v63  ;;  %v307_v56 = vld [vmem:[#allocation3 + $0xc8] sm:$0xff]  ;;  %v308_v57 = vld [vmem:[#allocation3 + $0xd0] sm:$0xff]  ;;  %p479_p9 = pnand %p478_p8, %p472_p5 }
  0x1e   :  { %vm143_vm9 = vcmp.ge.f32.partialorder %v139_v55, 1.0  ;;  %v422_v0 = vsel %vm142_vm8, 1.0, %v498_v15  ;;  %v159_v1 = vsel %vm142_vm8, 0.0, %v138_v54  ;;  %v227_v19 = vmul.f32 0.5, %v215_v7  ;;  %v309_v7 = vld [vmem:[#allocation3 + $0xd8] sm:$0xff] }
  0x1f   :  { %v423_v2 = vsel %vm143_vm9, 1.0, %v498_v15  ;;  %v160_v3 = vsel %vm143_vm9, 0.0, %v139_v55  ;;  %155 = vst [vmem:[#allocation6 + $0x40] sm:$0xff] %v422_v0  ;;  %v176_v4 = vmul.f32 0.5, %v159_v1  ;;  %vm144_vm10 = vcmp.ge.f32.partialorder %v140_v61, 1.0 }
  0x20   :  { %156 = vst [vmem:[#allocation6 + $0x48] sm:$0xff] %v423_v2  ;;  %v177_v5 = vmul.f32 0.5, %v160_v3  ;;  %v141_v6 = vadd.f32 %v137_v51, %v133_v60  ;;  %v424_v9 = vsel %vm144_vm10, 1.0, %v498_v15  ;;  %v161_v10 = vsel %vm144_vm10, 0.0, %v140_v61 }
  0x21   :  { %157 = vst [vmem:[#allocation6 + $0x50] sm:$0xff] %v424_v9  ;;  %v178_v13 = vmul.f32 0.5, %v161_v10  ;;  %v184_v14 = vadd.f32 %v180_v52, %v176_v4  ;;  %v228_v20 = vmul.f32 0.5, %v216_v8  ;;  %v229_v36 = vmul.f32 0.5, %v217_v23  ;;  %v352_v8 = vld [vmem:[#allocation3 + $0xe0] sm:$0xff] }
  0x22   :  { %vm145_vm11 = vcmp.ge.f32.partialorder %v141_v6, 1.0  ;;  %v185_v16 = vadd.f32 %v181_v58, %v177_v5  ;;  %v272_v37 = vmul.f32 0.5, %v260_v24  ;;  %v273_v43 = vmul.f32 0.5, %v261_v32  ;;  %v355_v32 = vld [vmem:[#allocation3 + $0xf8] sm:$0xff] }
  0x23   :  { %v425_v17 = vsel %vm145_vm11, 1.0, %v498_v15  ;;  %v162_v18 = vsel %vm145_vm11, 0.0, %v141_v6  ;;  %vm188_vm12 = vcmp.ge.f32.partialorder %v184_v14, 1.0  ;;  %v186_v22 = vadd.f32 %v182_v59, %v178_v13 }
  0x24   :  { %158 = vst [vmem:[#allocation6 + $0x58] sm:$0xff] %v425_v17  ;;  %v179_v21 = vmul.f32 0.5, %v162_v18  ;;  %vm189_vm13 = vcmp.ge.f32.partialorder %v185_v16, 1.0  ;;  %v426_v25 = vsel %vm188_vm12, 1.0, %v498_v15  ;;  %v205_v26 = vsel %vm188_vm12, 0.0, %v184_v14  ;;  %v353_v17 = vld [vmem:[#allocation3 + $0xe8] sm:$0xff] }
  0x25   :  { %v427_v27 = vsel %vm189_vm13, 1.0, %v498_v15  ;;  %v206_v28 = vsel %vm189_vm13, 0.0, %v185_v16  ;;  %201 = vst [vmem:[#allocation6 + $0x60] sm:$0xff] %v426_v25  ;;  %v222_v29 = vmul.f32 0.5, %v205_v26  ;;  %vm190_vm14 = vcmp.ge.f32.partialorder %v186_v22, 1.0  ;;  %v354_v18 = vld [vmem:[#allocation3 + $0xf0] sm:$0xff] }
  0x26   :  { %202 = vst [vmem:[#allocation6 + $0x68] sm:$0xff] %v427_v27  ;;  %v223_v30 = vmul.f32 0.5, %v206_v28  ;;  %v187_v31 = vadd.f32 %v183_v11, %v179_v21  ;;  %v428_v34 = vsel %vm190_vm14, 1.0, %v498_v15  ;;  %v207_v35 = vsel %vm190_vm14, 0.0, %v186_v22 }
  0x27   :  { %203 = vst [vmem:[#allocation6 + $0x70] sm:$0xff] %v428_v34  ;;  %v224_v38 = vmul.f32 0.5, %v207_v35  ;;  %v230_v39 = vadd.f32 %v226_v12, %v222_v29  ;;  %v274_v44 = vmul.f32 0.5, %v262_v33  ;;  %v275_v60 = vmul.f32 0.5, %v263_v47 }
  0x28   :  { %vm191_vm15 = vcmp.ge.f32.partialorder %v187_v31, 1.0  ;;  %v231_v40 = vadd.f32 %v227_v19, %v223_v30  ;;  %v318_v61 = vmul.f32 0.5, %v306_v48  ;;  %v319_v3 = vmul.f32 0.5, %v307_v56 }
  0x29   :  { %v429_v41 = vsel %vm191_vm15, 1.0, %v498_v15  ;;  %v208_v42 = vsel %vm191_vm15, 0.0, %v187_v31  ;;  %vm234_vm0 = vcmp.ge.f32.partialorder %v230_v39, 1.0  ;;  %v232_v46 = vadd.f32 %v228_v20, %v224_v38 }
  0x2a   :  { %204 = vst [vmem:[#allocation6 + $0x78] sm:$0xff] %v429_v41  ;;  %v225_v45 = vmul.f32 0.5, %v208_v42  ;;  %vm235_vm1 = vcmp.ge.f32.partialorder %v231_v40, 1.0  ;;  %v430_v49 = vsel %vm234_vm0, 1.0, %v498_v15  ;;  %v251_v50 = vsel %vm234_vm0, 0.0, %v230_v39 }
  0x2b   :  { %v431_v51 = vsel %vm235_vm1, 1.0, %v498_v15  ;;  %v252_v52 = vsel %vm235_vm1, 0.0, %v231_v40  ;;  %247 = vst [vmem:[#allocation6 + $0x80] sm:$0xff] %v430_v49  ;;  %v268_v53 = vmul.f32 0.5, %v251_v50  ;;  %vm236_vm2 = vcmp.ge.f32.partialorder %v232_v46, 1.0 }
  0x2c   :  { %248 = vst [vmem:[#allocation6 + $0x88] sm:$0xff] %v431_v51  ;;  %v269_v54 = vmul.f32 0.5, %v252_v52  ;;  %v233_v55 = vadd.f32 %v229_v36, %v225_v45  ;;  %v432_v58 = vsel %vm236_vm2, 1.0, %v498_v15  ;;  %v253_v59 = vsel %vm236_vm2, 0.0, %v232_v46 }
  0x2d   :  { %249 = vst [vmem:[#allocation6 + $0x90] sm:$0xff] %v432_v58  ;;  %v270_v62 = vmul.f32 0.5, %v253_v59  ;;  %v276_v63 = vadd.f32 %v272_v37, %v268_v53  ;;  %v320_v4 = vmul.f32 0.5, %v308_v57  ;;  %v321_v21 = vmul.f32 0.5, %v309_v7 }
  0x2e   :  { %vm237_vm3 = vcmp.ge.f32.partialorder %v233_v55, 1.0  ;;  %v277_v0 = vadd.f32 %v273_v43, %v269_v54  ;;  %v364_v22 = vmul.f32 0.5, %v352_v8  ;;  %v365_v28 = vmul.f32 0.5, %v353_v17 }
  0x2f   :  { %v433_v1 = vsel %vm237_vm3, 1.0, %v498_v15  ;;  %v254_v2 = vsel %vm237_vm3, 0.0, %v233_v55  ;;  %vm280_vm4 = vcmp.ge.f32.partialorder %v276_v63, 1.0  ;;  %v278_v6 = vadd.f32 %v274_v44, %v270_v62 }
  0x30   :  { %250 = vst [vmem:[#allocation6 + $0x98] sm:$0xff] %v433_v1  ;;  %v271_v5 = vmul.f32 0.5, %v254_v2  ;;  %vm281_vm5 = vcmp.ge.f32.partialorder %v277_v0, 1.0  ;;  %v434_v9 = vsel %vm280_vm4, 1.0, %v498_v15  ;;  %v297_v10 = vsel %vm280_vm4, 0.0, %v276_v63 }
  0x31   :  { %v435_v11 = vsel %vm281_vm5, 1.0, %v498_v15  ;;  %v298_v12 = vsel %vm281_vm5, 0.0, %v277_v0  ;;  %293 = vst [vmem:[#allocation6 + $0xa0] sm:$0xff] %v434_v9  ;;  %v314_v13 = vmul.f32 0.5, %v297_v10  ;;  %vm282_vm6 = vcmp.ge.f32.partialorder %v278_v6, 1.0 }
  0x32   :  { %294 = vst [vmem:[#allocation6 + $0xa8] sm:$0xff] %v435_v11  ;;  %v315_v14 = vmul.f32 0.5, %v298_v12  ;;  %v279_v16 = vadd.f32 %v275_v60, %v271_v5  ;;  %v436_v19 = vsel %vm282_vm6, 1.0, %v498_v15  ;;  %v299_v20 = vsel %vm282_vm6, 0.0, %v278_v6 }
  0x33   :  { %295 = vst [vmem:[#allocation6 + $0xb0] sm:$0xff] %v436_v19  ;;  %v316_v23 = vmul.f32 0.5, %v299_v20  ;;  %v322_v24 = vadd.f32 %v318_v61, %v314_v13  ;;  %v366_v29 = vmul.f32 0.5, %v354_v18  ;;  %v367_v42 = vmul.f32 0.5, %v355_v32 }
  0x34   :  { %vm283_vm7 = vcmp.ge.f32.partialorder %v279_v16, 1.0  ;;  %v323_v25 = vadd.f32 %v319_v3, %v315_v14 }
  0x35   :  { %v437_v26 = vsel %vm283_vm7, 1.0, %v498_v15  ;;  %v300_v27 = vsel %vm283_vm7, 0.0, %v279_v16  ;;  %vm326_vm8 = vcmp.ge.f32.partialorder %v322_v24, 1.0  ;;  %v324_v31 = vadd.f32 %v320_v4, %v316_v23 }
  0x36   :  { %296 = vst [vmem:[#allocation6 + $0xb8] sm:$0xff] %v437_v26  ;;  %v317_v30 = vmul.f32 0.5, %v300_v27  ;;  %vm327_vm9 = vcmp.ge.f32.partialorder %v323_v25, 1.0  ;;  %v438_v33 = vsel %vm326_vm8, 1.0, %v498_v15  ;;  %v343_v34 = vsel %vm326_vm8, 0.0, %v322_v24 }
  0x37   :  { %v439_v35 = vsel %vm327_vm9, 1.0, %v498_v15  ;;  %v344_v36 = vsel %vm327_vm9, 0.0, %v323_v25  ;;  %339 = vst [vmem:[#allocation6 + $0xc0] sm:$0xff] %v438_v33  ;;  %v360_v37 = vmul.f32 0.5, %v343_v34  ;;  %vm328_vm10 = vcmp.ge.f32.partialorder %v324_v31, 1.0 }
  0x38   :  { %340 = vst [vmem:[#allocation6 + $0xc8] sm:$0xff] %v439_v35  ;;  %v361_v38 = vmul.f32 0.5, %v344_v36  ;;  %v325_v39 = vadd.f32 %v321_v21, %v317_v30  ;;  %v440_v40 = vsel %vm328_vm10, 1.0, %v498_v15  ;;  %v345_v41 = vsel %vm328_vm10, 0.0, %v324_v31 }
  0x39   :  { %341 = vst [vmem:[#allocation6 + $0xd0] sm:$0xff] %v440_v40  ;;  %v362_v43 = vmul.f32 0.5, %v345_v41  ;;  %v368_v44 = vadd.f32 %v364_v22, %v360_v37 }
  0x3a   :  { %vm329_vm11 = vcmp.ge.f32.partialorder %v325_v39, 1.0  ;;  %v369_v45 = vadd.f32 %v365_v28, %v361_v38 }
  0x3b   :  { %v441_v46 = vsel %vm329_vm11, 1.0, %v498_v15  ;;  %v346_v47 = vsel %vm329_vm11, 0.0, %v325_v39  ;;  %vm372_vm12 = vcmp.ge.f32.partialorder %v368_v44, 1.0  ;;  %v370_v49 = vadd.f32 %v366_v29, %v362_v43 }
  0x3c   :  { %342 = vst [vmem:[#allocation6 + $0xd8] sm:$0xff] %v441_v46  ;;  %v363_v48 = vmul.f32 0.5, %v346_v47  ;;  %vm373_vm13 = vcmp.ge.f32.partialorder %v369_v45, 1.0  ;;  %v442_v50 = vsel %vm372_vm12, 1.0, %v498_v15 }
  0x3d   :  { %v443_v51 = vsel %vm373_vm13, 1.0, %v498_v15  ;;  %385 = vst [vmem:[#allocation6 + $0xe0] sm:$0xff] %v442_v50  ;;  %vm374_vm14 = vcmp.ge.f32.partialorder %v370_v49, 1.0 }
  0x3e   :  { %386 = vst [vmem:[#allocation6 + $0xe8] sm:$0xff] %v443_v51  ;;  %v371_v52 = vadd.f32 %v367_v42, %v363_v48  ;;  %v444_v53 = vsel %vm374_vm14, 1.0, %v498_v15 }
  0x3f   :  { %387 = vst [vmem:[#allocation6 + $0xf0] sm:$0xff] %v444_v53 }
  0x40   :  { %vm375_vm15 = vcmp.ge.f32.partialorder %v371_v52, 1.0 }
  0x41   :  { %v445_v54 = vsel %vm375_vm15, 1.0, %v498_v15 }
  0x42   :  { %388 = vst [vmem:[#allocation6 + $0xf8] sm:$0xff] %v445_v54 }
  0x43   :  { %482 = shalt.err (!%p479_p9)
}
  0x44   :  { %408 = dma.vmem_to_hbm [thread:$0]  %s403_s13, 4096, %s555_s1, [#allocation5], %s496_s9, %s496_s9, %s497_s10  }
  0x45   :  { %493 = dma.done.wait [#allocation5], 4096  }
  0x46   :  { %494 = vsyncadd [#allocation5], 4294963200 }
  0x47   :  { %412 = vsyncpa [#allocation4], 1 }
  0x48   :  { %413 = vsyncpa [#allocation5], 1 }

</bundles_post_ra>
